<compile_context>
chip_gen: v5e
topology: v5e:2x2
jax: 0.10.0
libtpu: 0.0.40
codegen_flags: <defaults>
</compile_context>

<pallas_src>
import functools

import jax
import jax.numpy as jnp
from jax import lax
from jax.experimental import pallas as pl
from jax.experimental.pallas import tpu as pltpu


def _cosface_kernel(emb_ref, w_ref, invwn_ref, ids_ref, out_ref, *, s, m, mxu_dtype):
    # (tb, D) row-normalized embeddings: one rsqrt (EUP) + one multiply (VPU).
    emb = emb_ref[...]
    emb_n = emb * lax.rsqrt(jnp.sum(emb * emb, axis=1, keepdims=True))

    # MXU matmul; column normalization is folded into a post-matmul (1, tn)
    # scale instead of materializing a normalized (D, tn) weight tile.
    cos = jnp.dot(
        emb_n.astype(mxu_dtype),
        w_ref[...].astype(mxu_dtype),
        preferred_element_type=jnp.float32,
    )
    cos = jnp.clip(cos * invwn_ref[...], -1.0, 1.0)

    # Margin: subtract m at the label column of each row. Equivalent to the
    # reference argmax + scatter for one-hot labels; the argmax itself runs in
    # the wrapper so only (tb, 1) int32 ids reach the kernel.
    tb, tn = cos.shape
    col = lax.broadcasted_iota(jnp.int32, (tb, tn), 1) + pl.program_id(1) * tn
    m_hot = jnp.where(col == ids_ref[...], jnp.float32(m), jnp.float32(0.0))

    out_ref[...] = (cos - m_hot) * jnp.float32(s)


def _pick_tile(dim, candidates):
    for c in candidates:
        if c <= dim and dim % c == 0:
            return c
    return dim  # fall back to the full (untiled) extent


def cosface_forward(embeddings, weight, label, *, s=64.0, m=0.2,
                    tb=None, tn=None, mxu_dtype=jnp.bfloat16):
    """CosFace forward. embeddings (B, D) f32, weight (D, N) f32,
    label (B, N) one-hot float. Returns (B, N) f32 scaled logits."""
    embeddings = embeddings.astype(jnp.float32)
    weight = weight.astype(jnp.float32)
    B, D = embeddings.shape
    D2, N = weight.shape
    assert D == D2 and label.shape == (B, N)

    # Tile sizes: batch rows up to 256 (full MXU height on v6e/v7x), class
    # columns up to 2048 (keeps double-buffered weight tiles well inside the
    # 16/32 MiB scoped-VMEM defaults across v5e/v6e/v7x for typical D<=512).
    if tb is None:
        tb = _pick_tile(B, (256, 128, 64, 32, 16, 8))
    if tn is None:
        tn = _pick_tile(N, (2048, 1024, 512, 256, 128))

    # Tiny XLA precompute (hoisted out of the kernel so it is not redone once
    # per batch-tile): inverse column L2 norms and integer class ids.
    inv_wn = lax.rsqrt(jnp.sum(weight * weight, axis=0, keepdims=True))  # (1, N)
    ids = jnp.argmax(label, axis=1).astype(jnp.int32)[:, None]           # (B, 1)

    kernel = functools.partial(_cosface_kernel, s=s, m=m, mxu_dtype=mxu_dtype)

    return pl.pallas_call(
        kernel,
        out_shape=jax.ShapeDtypeStruct((B, N), jnp.float32),
        grid_spec=pltpu.PrefetchScalarGridSpec(
            num_scalar_prefetch=0,
            grid=(pl.cdiv(B, tb), pl.cdiv(N, tn)),
            in_specs=[
                pl.BlockSpec((tb, D), lambda i, j: (i, 0)),   # embeddings
                pl.BlockSpec((D, tn), lambda i, j: (0, j)),   # weight
                pl.BlockSpec((1, tn), lambda i, j: (0, j)),   # inv column norms
                pl.BlockSpec((tb, 1), lambda i, j: (i, 0)),   # class ids
            ],
            out_specs=pl.BlockSpec((tb, tn), lambda i, j: (i, j)),
        ),
        compiler_params=pltpu.CompilerParams(
            dimension_semantics=("parallel", "parallel"),
        ),
    )(embeddings, weight, inv_wn, ids)


if __name__ == "__main__":
    B, D, N = 8, 32, 128        # batch, in_features, out_features

    key = jax.random.PRNGKey(0)
    k_emb, k_w, k_lab = jax.random.split(key, 3)

    embeddings = jax.random.normal(k_emb, (B, D), dtype=jnp.float32)
    # nn.init.normal_(self.kernel, std=0.01) — deterministic synthetic init
    weight = 0.01 * jax.random.normal(k_w, (D, N), dtype=jnp.float32)
    # one-hot labels (float), as implied by torch.argmax(label, dim=1)
    class_ids = jax.random.randint(k_lab, (B,), 0, N)
    label = jax.nn.one_hot(class_ids, N, dtype=jnp.float32)

    # Pure-JAX f32 reference, faithful to the PyTorch module.
    emb_n = embeddings / jnp.linalg.norm(embeddings, axis=1, keepdims=True)
    w_n = weight / jnp.linalg.norm(weight, axis=0, keepdims=True)
    ref = (jnp.clip(emb_n @ w_n, -1.0, 1.0) - 0.2 * label) * 64.0

    # Exact-math path (f32 MXU operands): tight tolerance.
    out_f32 = cosface_forward(embeddings, weight, label, s=64.0, m=0.2,
                              mxu_dtype=jnp.float32)
    jax.block_until_ready(out_f32)
    assert jnp.allclose(out_f32, ref, atol=1e-3), "f32 kernel mismatch vs reference"

    # Performance path (bf16 MXU operands, f32 accumulation). bf16 input
    # rounding (~2^-9 relative on unit-norm cosines) amplified by s=64 bounds
    # the absolute error well below 0.5.
    out = cosface_forward(embeddings, weight, label, s=64.0, m=0.2)
    jax.block_until_ready(out)
    assert jnp.allclose(out, ref, atol=0.5), "bf16 kernel mismatch vs reference"

    print("KERNEL_OK")
</pallas_src>

<mosaic_0001>
module attributes {stable_mosaic.version = 11 : i64} {
  func.func @_cosface_kernel(%arg0: i32, %arg1: i32, %arg2: memref<8x32xf32, #tpu.memory_space<vmem>>, %arg3: memref<32x128xf32, #tpu.memory_space<vmem>>, %arg4: memref<1x128xf32, #tpu.memory_space<vmem>>, %arg5: memref<8x1xi32, #tpu.memory_space<vmem>>, %arg6: memref<8x128xf32, #tpu.memory_space<vmem>>) attributes {dimension_semantics = [#tpu.dimension_semantics<parallel>, #tpu.dimension_semantics<parallel>], iteration_bounds = array<i64: 1, 1>, scalar_prefetch = 0 : i64, scratch_operands = 0 : i64, tpu.core_type = #tpu.core_type<tc>, window_params = [{transform_indices = @transform_0, window_bounds = array<i64: 8, 32>}, {transform_indices = @transform_1, window_bounds = array<i64: 32, 128>}, {transform_indices = @transform_2, window_bounds = array<i64: 1, 128>}, {transform_indices = @transform_3, window_bounds = array<i64: 8, 1>}, {transform_indices = @transform_4, window_bounds = array<i64: 8, 128>}]} {
    %c0 = arith.constant 0 : index
    %c0_0 = arith.constant 0 : index
    %0 = vector.load %arg2[%c0, %c0_0] : memref<8x32xf32, #tpu.memory_space<vmem>>, vector<8x32xf32>
    %1 = arith.mulf %0, %0 : vector<8x32xf32>
    %cst = arith.constant dense<0.000000e+00> : vector<8xf32>
    %2 = vector.multi_reduction <add>, %1, %cst [1] : vector<8x32xf32> to vector<8xf32>
    %3 = vector.shape_cast %2 : vector<8xf32> to vector<8x1xf32>
    %4 = math.rsqrt %3 : vector<8x1xf32>
    %5 = vector.broadcast %4 : vector<8x1xf32> to vector<8x32xf32>
    %6 = arith.mulf %0, %5 : vector<8x32xf32>
    %c0_1 = arith.constant 0 : index
    %c0_2 = arith.constant 0 : index
    %7 = vector.load %arg3[%c0_1, %c0_2] : memref<32x128xf32, #tpu.memory_space<vmem>>, vector<32x128xf32>
    %cst_3 = arith.constant dense<0.000000e+00> : vector<8x128xf32>
    %8 = tpu.matmul %6, %7, %cst_3 {dimension_numbers = #tpu.dot_dimension_numbers<[1], [0], [0], [1], [0, 0, 1, 1], [], []>} : vector<8x32xf32>, vector<32x128xf32>, vector<8x128xf32> -> vector<8x128xf32>
    %c0_4 = arith.constant 0 : index
    %c0_5 = arith.constant 0 : index
    %9 = vector.load %arg4[%c0_4, %c0_5] : memref<1x128xf32, #tpu.memory_space<vmem>>, vector<1x128xf32>
    %10 = vector.broadcast %9 : vector<1x128xf32> to vector<8x128xf32>
    %11 = arith.mulf %8, %10 : vector<8x128xf32>
    %cst_6 = arith.constant -1.000000e+00 : f32
    %cst_7 = arith.constant 1.000000e+00 : f32
    %12 = vector.broadcast %cst_6 : f32 to vector<8x128xf32>
    %13 = arith.maximumf %12, %11 : vector<8x128xf32>
    %14 = vector.broadcast %cst_7 : f32 to vector<8x128xf32>
    %15 = arith.minimumf %14, %13 : vector<8x128xf32>
    %16 = tpu.iota {dimensions = array<i32: 1>} : vector<8x128xi32>
    %c128_i32 = arith.constant 128 : i32
    %17 = arith.muli %arg1, %c128_i32 : i32
    %18 = vector.broadcast %17 : i32 to vector<8x128xi32>
    %19 = arith.addi %16, %18 : vector<8x128xi32>
    %c0_8 = arith.constant 0 : index
    %c0_9 = arith.constant 0 : index
    %20 = vector.load %arg5[%c0_8, %c0_9] : memref<8x1xi32, #tpu.memory_space<vmem>>, vector<8x1xi32>
    %21 = vector.broadcast %20 : vector<8x1xi32> to vector<8x128xi32>
    %22 = arith.cmpi eq, %19, %21 : vector<8x128xi32>
    %cst_10 = arith.constant 2.000000e-01 : f32
    %cst_11 = arith.constant 0.000000e+00 : f32
    %23 = vector.broadcast %cst_10 : f32 to vector<8x128xf32>
    %24 = vector.broadcast %cst_11 : f32 to vector<8x128xf32>
    %25 = arith.select %22, %23, %24 : vector<8x128xi1>, vector<8x128xf32>
    %26 = arith.subf %15, %25 : vector<8x128xf32>
    %cst_12 = arith.constant 6.400000e+01 : f32
    %27 = vector.broadcast %cst_12 : f32 to vector<8x128xf32>
    %28 = arith.mulf %26, %27 : vector<8x128xf32>
    %c0_13 = arith.constant 0 : index
    %c0_14 = arith.constant 0 : index
    %29 = vector.load %arg6[%c0_13, %c0_14] : memref<8x128xf32, #tpu.memory_space<vmem>>, vector<8x128xf32>
    tpu.vector_store %arg6[%c0_13, %c0_14], %28 {strides = array<i32>} : memref<8x128xf32, #tpu.memory_space<vmem>>, vector<8x128xf32>,
    return
  }
  func.func @transform_0(%arg0: i32, %arg1: i32) -> (i32, i32) {
    %c0_i32 = arith.constant 0 : i32
    %c0_i32_0 = arith.constant 0 : i32
    return %arg0, %c0_i32 : i32, i32
  }
  func.func @transform_1(%arg0: i32, %arg1: i32) -> (i32, i32) {
    %c0_i32 = arith.constant 0 : i32
    %c0_i32_0 = arith.constant 0 : i32
    return %c0_i32, %arg1 : i32, i32
  }
  func.func @transform_2(%arg0: i32, %arg1: i32) -> (i32, i32) {
    %c0_i32 = arith.constant 0 : i32
    %c0_i32_0 = arith.constant 0 : i32
    return %c0_i32, %arg1 : i32, i32
  }
  func.func @transform_3(%arg0: i32, %arg1: i32) -> (i32, i32) {
    %c0_i32 = arith.constant 0 : i32
    %c0_i32_0 = arith.constant 0 : i32
    return %arg0, %c0_i32 : i32, i32
  }
  func.func @transform_4(%arg0: i32, %arg1: i32) -> (i32, i32) {
    %c0_i32 = arith.constant 0 : i32
    return %arg0, %arg1 : i32, i32
  }
}

</mosaic_0001>

<bundles_post_ra>
// kernel: tpu_custom_call.1
= control target key start
LH: loop header
LB: loop body
LE: loop exit
PB: predicated region body
PF: predicated region fallthrough
CT: control target
= control target key end

     0   :  { %9 = vsyncpa [#allocation3], 0  ;;  %s228_s0 = inlined_call_operand.vmem [shape: f32[8,32], index: 0, kind: input, shape index: {}]   ;;  %s229_s1 = inlined_call_operand.hbm [shape: f32[32,128], index: 1, kind: input, shape index: {}]   ;;  %s230_s2 = inlined_call_operand.vmem [shape: f32[1,128], index: 2, kind: input, shape index: {}]   ;;  %s231_s3 = inlined_call_operand.vmem [shape: s32[8,1], index: 3, kind: input, shape index: {}]   ;;  %s232_s4 = inlined_call_operand.hbm [shape: f32[8,128], index: 4, kind: output, shape index: {}]  }
   0x1   :  { %10 = vsyncpa [#allocation4], 0  ;;  %s17_s17 = sshll.u32 %s229_s1, 4  ;;  %s180_s18 = smov [#allocation2]   ;;  %s18_s17 = int_to_ptr.hbm [resolvable:$true] %s17_s17 }
   0x2   :  { %s19_s19 = sshll.u32 %s180_s18, 4  ;;  %s181_s20 = smov 128   ;;  %s20_s19 = int_to_ptr.vmem [resolvable:$true] %s19_s19 }
   0x3   :  { %s182_s21 = smov 8  }
   0x4   :  { %25 = dma.hbm_to_vmem [thread:$0]  %s18_s17, 512, %s20_s19, [#allocation3], %s181_s20, %s181_s20, %s182_s21  }
   0x5   :  { %176 = dma.done.wait [#allocation3], 512  }
   0x6   :  { %177 = vsyncadd [#allocation3], 4294966784  ;;  %v34_v0 = vld [vmem:[%s228_s0] sm:$0xff]  ;;  %vm36_vm0 = vcmask 261120   ;;  %v54_v3 = vld [vmem:[#allocation2 + $0x18] sm:$0xff]  ;;  %v183_v8 = vmov 0   ;;  %v85_v18 = vlaneseq }
   0x7   :  { %v35_v1 = vmul.f32 %v34_v0, %v34_v0  ;;  %70 = vmatpush.msra.mxu0 %v54_v3  ;;  %v53_v4 = vld [vmem:[#allocation2 + $0x10] sm:$0xff]  ;;  %v52_v5 = vld [vmem:[#allocation2 + $0x8] sm:$0xff]  ;;  %v51_v6 = vld [vmem:[#allocation2] sm:$0xff]  ;;  %124 = vset.pattern.permute.xlu0 %v183_v8  ;;  %v184_v24 = vmov 0.0   ;;  %s185_s25 = smov [#allocation5]   ;;  %s106_s29 = sshll.u32 %s232_s4, 4  ;;  %s107_s29 = int_to_ptr.hbm [resolvable:$true] %s106_s29 }
   0x8   :  { %v90_v7 = vld [vmem:[%s231_s3] sm:$0xff]  ;;  %v86_v19 = vand.u32 127, %v85_v18  ;;  %s104_s26 = sshll.u32 %s185_s25, 4  ;;  %s105_s26 = int_to_ptr.vmem [resolvable:$true] %s104_s26 }
   0x9   :  { %v37_v2 = vsel %vm36_vm0, %v35_v1, 0.0  ;;  %71 = vmatpush.msra.mxu0 %v53_v4  ;;  %v125_v21 = vld [vmem:[%s230_s2] ss:$0 sm:$0xff] }
   0xa   :  { %38 = vadd.xlane.f32.xlu0 %v37_v2 }
   0xb   :  { %72 = vmatpush.msra.mxu0 %v52_v5 }
   0xd   :  { %73 = vmatpush.msra.mxu0 %v51_v6 }
  0x1e   :  { %92 = vperm.xlu0 %124, %v90_v7  }
  0x7d   :  { %v39_v9 = vpop.xlane.xlu0 %38 }
  0x7e   :  { %126 = vrsqrt.f32 %v39_v9  ;;  %vm46_vm2 = vweird.f32 %v39_v9 }
  0x84   :  { %v127_v10 = vpop.eup %126 }
  0x85   :  { %v41_v11 = vmul.f32 %v127_v10, %v39_v9  ;;  %vm47_vm1 = vweird.f32 %v127_v10 }
  0x86   :  { %vm48_vm3 = vmor %vm46_vm2, %vm47_vm1 }
  0x87   :  { %v42_v12 = vmul.f32 %v127_v10, %v41_v11 }
  0x89   :  { %v43_v13 = vmul.f32 0.5, %v42_v12 }
  0x8b   :  { %v44_v14 = vsub.f32 1.5, %v43_v13 }
  0x8d   :  { %v45_v15 = vmul.f32 %v127_v10, %v44_v14 }
  0x8f   :  { %v49_v16 = vsel %vm48_vm3, %v127_v10, %v45_v15 }
  0x90   :  { %v50_v17 = vmul.f32 %v49_v16, %v34_v0  ;;  %v93_v20 = vpop.permute.xlu0 %92 }
  0x91   :  { %vm94_vm4 = vcmp.eq.s32.totalorder %v86_v19, %v93_v20 }
  0x92   :  { %116 = vmatmul.msk.f32.vlgmr.msra.gmra.mxu0 %vm36_vm0, %v50_v17  ;;  %v95_v25 = vsel %vm94_vm4, 0.2, %v184_v24 }
 0x10f   :  { %v75_v22 = vpop.f32.mrf.mxu0 }
 0x110   :  { %v82_v23 = vmul.f32 %v125_v21, %v75_v22 }
 0x112   :  { %v117_v26 = vclamps-f32 %v82_v23, 1.0 }
 0x114   :  { %v96_v27 = vsub.f32 %v117_v26, %v95_v25 }
 0x116   :  { %v97_v28 = vmul.f32 64.0, %v96_v27 }
 0x118   :  { %98 = vst [vmem:[#allocation5] sm:$0xff] %v97_v28 }
 0x119   :  { %109 = dma.vmem_to_hbm [thread:$0]  %s105_s26, 128, %s107_s29, [#allocation4]  }
 0x11a   :  { %178 = dma.done.wait [#allocation4], 128  }
 0x11b   :  { %179 = vsyncadd [#allocation4], 4294967168 }
 0x11c   :  { %114 = vsyncpa [#allocation3], 1 }
 0x11d   :  { %115 = vsyncpa [#allocation4], 1 }

</bundles_post_ra>
